<compile_context>
chip_gen: v7x
topology: tpu7x:2x2x1
jax: 0.10.0
libtpu: 0.0.40
codegen_flags: <defaults>
</compile_context>

<pallas_src>
import jax
import jax.numpy as jnp
from jax.experimental import pallas as pl
from jax.experimental.pallas import tpu as pltpu

_CENTER_RADIUS = 2.5
_LANES = 128


def _round_up(x, m):
    return ((x + m - 1) // m) * m


def _yolox_obj_loss_kernel(nlabel_ref, labels_ref, geo_ref, obj_ref, part_ref):
    """One (anchor-tile a, batch b) grid step.

    nlabel_ref: SMEM (B,) int32         number of valid GT rows per batch
    labels_ref: SMEM (B, M*5) f32       flattened [cls, cx, cy, w, h] per GT row
    geo_ref:    VMEM (4, rows_tile, 128) f32
                rows = [x_center, y_center, 2.5*stride, anchor_valid]
    obj_ref:    VMEM (1, rows_tile, 128) obj logits (outputs[:, :, 4]), any float
    part_ref:   VMEM (1, 128) f32       partials: lane0=sum_bce, lane1=num_fg
    """
    b = pl.program_id(1)

    x_c = geo_ref[0]      # (rows_tile, 128) anchor centers, pixels
    y_c = geo_ref[1]
    rad = geo_ref[2]      # 2.5 * stride (center prior radius)
    a_ok = geo_ref[3]     # 1.0 real anchor / 0.0 lane/sublane padding

    num_gt = nlabel_ref[b]

    # ---- foreground mask: OR over the *real* GT rows only (dynamic bound) ----
    def gt_body(m, fg):
        base = m * 5
        cx = labels_ref[b, base + 1]
        cy = labels_ref[b, base + 2]
        half_w = 0.5 * labels_ref[b, base + 3]
        half_h = 0.5 * labels_ref[b, base + 4]
        dx = jnp.abs(x_c - cx)
        dy = jnp.abs(y_c - cy)
        in_box = (dx < half_w) & (dy < half_h)      # strict, matches YOLOX
        in_ctr = (dx < rad) & (dy < rad)            # fixed-radius center prior
        return jnp.maximum(fg, (in_box | in_ctr).astype(jnp.float32))

    fg_f = jax.lax.fori_loop(0, num_gt, gt_body, jnp.zeros_like(x_c)) * a_ok

    # ---- BCEWithLogitsLoss(reduction='none'), numerically stable form ----
    #   max(x, 0) - x * t + log(1 + exp(-|x|))
    # (log1p would be marginally more precise for large |x| but log(1+u) with
    #  u in (0,1] is within ~1e-7 absolute; keep the known-lowering form.)
    obj = obj_ref[0].astype(jnp.float32)            # (rows_tile, 128)
    bce = (jnp.maximum(obj, 0.0) - obj * fg_f
           + jnp.log(1.0 + jnp.exp(-jnp.abs(obj)))) * a_ok

    lane = jax.lax.broadcasted_iota(jnp.int32, part_ref.shape, 1)
    part_ref[...] = (jnp.where(lane == 0, jnp.sum(bce), jnp.float32(0.0))
                     + jnp.where(lane == 1, jnp.sum(fg_f), jnp.float32(0.0)))


class YOLOXObjLoss:
    """JAX/Pallas re-implementation of losses/yolox_obj/Loss (objectness term)."""

    def __init__(self, loss_cfg):
        self.loss_cfg = loss_cfg
        self.num_classes = loss_cfg["num_classes"]

    def __call__(self, y, y_hat):
        return self.get_losses(y, *y_hat)

    def get_losses(self, y, imgs, x_shifts, y_shifts, expanded_strides, labels,
                   outputs, origin_preds, dtype):
        del y, imgs, origin_preds  # only used by the external SimOTA assignment
        B, A, _ = outputs.shape
        M = labels.shape[1]

        # mixup handling: keep only the first 5 label columns; flatten for SMEM.
        label_cut = (labels[..., :5] if labels.shape[2] > 5 else labels)
        label_cut = label_cut.astype(jnp.float32)
        nlabel = jnp.sum(jnp.sum(label_cut, axis=2) > 0.0, axis=1).astype(jnp.int32)
        labels2d = label_cut.reshape(B, M * 5)

        # Anchor geometry (static per model config; constant-folded under jit).
        xs = jnp.concatenate(x_shifts, axis=1).astype(jnp.float32)          # (1, A)
        ys = jnp.concatenate(y_shifts, axis=1).astype(jnp.float32)
        es = jnp.concatenate(expanded_strides, axis=1).astype(jnp.float32)

        # Dense (rows, 128) anchor layout; sublane multiple depends on dtype.
        sub = {4: 8, 2: 16, 1: 32}.get(outputs.dtype.itemsize, 8)
        rows = pl.cdiv(A, _LANES)
        rows_tile = min(_round_up(rows, sub), max(32, sub))  # <= 4096 anchors/tile
        n_a = pl.cdiv(rows, rows_tile)
        rows_pad = n_a * rows_tile
        a_pad = rows_pad * _LANES

        geo = jnp.concatenate(
            [(xs + 0.5) * es,            # anchor center x (pixels)
             (ys + 0.5) * es,            # anchor center y
             _CENTER_RADIUS * es,        # center-prior radius
             jnp.ones_like(es)],         # anchor validity
            axis=0)                                                         # (4, A)
        geo = jnp.pad(geo, ((0, 0), (0, a_pad - A))).reshape(4, rows_pad, _LANES)

        # Exact obj-channel extraction in the wrapper (lane/sublane-dense feed).
        obj = outputs[:, :, 4]
        obj = jnp.pad(obj, ((0, 0), (0, a_pad - A))).reshape(B, rows_pad, _LANES)

        partials = pl.pallas_call(
            _yolox_obj_loss_kernel,
            out_shape=jax.ShapeDtypeStruct((1, n_a * B * _LANES), jnp.float32),
            grid=(n_a, B),                                   # batch innermost
            in_specs=[
                pl.BlockSpec(memory_space=pltpu.MemorySpace.SMEM),       # nlabel
                pl.BlockSpec(memory_space=pltpu.MemorySpace.SMEM),       # labels
                # geo block index is constant over the inner (batch) loop ->
                # DMA'd only when the anchor-tile index changes (n_a times).
                pl.BlockSpec((4, rows_tile, _LANES), lambda a, b: (0, a, 0)),
                pl.BlockSpec((1, rows_tile, _LANES), lambda a, b: (b, a, 0)),
            ],
            out_specs=pl.BlockSpec((1, _LANES), lambda a, b: (0, a * B + b)),
            compiler_params=pltpu.CompilerParams(
                dimension_semantics=("parallel", "parallel")),
            cost_estimate=pl.CostEstimate(
                flops=int(B * a_pad * (12 * M + 12)),
                transcendentals=int(2 * B * a_pad),
                bytes_accessed=int(B * a_pad * outputs.dtype.itemsize
                                   + 4 * a_pad * 4
                                   + B * M * 5 * 4 + B * 4
                                   + n_a * B * _LANES * 4)),
        )(nlabel, labels2d, geo, obj)

        # Tiny cross-tile reduce + final divide in JAX.
        partials = partials.reshape(n_a * B, _LANES)
        sum_bce = jnp.sum(partials[:, 0])
        num_fg = jnp.maximum(jnp.sum(partials[:, 1]), 1.0)
        return (sum_bce / num_fg).astype(dtype)


def _reference_loss(labels, xs, ys, es, obj_logits):
    """Pure-JAX mirror of the kernel math (independent correctness check)."""
    valid = jnp.sum(labels, axis=2, keepdims=True) > 0.0
    gt_cx, gt_cy = labels[:, :, 1:2], labels[:, :, 2:3]
    gt_w, gt_h = labels[:, :, 3:4], labels[:, :, 4:5]
    A = xs.shape[1]
    x_c = ((xs + 0.5) * es).reshape(1, 1, A)
    y_c = ((ys + 0.5) * es).reshape(1, 1, A)
    strd = es.reshape(1, 1, A)
    in_box = ((x_c > gt_cx - 0.5 * gt_w) & (x_c < gt_cx + 0.5 * gt_w)
              & (y_c > gt_cy - 0.5 * gt_h) & (y_c < gt_cy + 0.5 * gt_h))
    in_ctr = ((x_c > gt_cx - _CENTER_RADIUS * strd) & (x_c < gt_cx + _CENTER_RADIUS * strd)
              & (y_c > gt_cy - _CENTER_RADIUS * strd) & (y_c < gt_cy + _CENTER_RADIUS * strd))
    fg = jnp.max(((in_box | in_ctr) & valid).astype(jnp.float32), axis=1)
    x = obj_logits.astype(jnp.float32)
    bce = jnp.maximum(x, 0.0) - x * fg + jnp.log(1.0 + jnp.exp(-jnp.abs(x)))
    return jnp.sum(bce) / jnp.maximum(jnp.sum(fg), 1.0)


if __name__ == "__main__":
    key = jax.random.PRNGKey(0)
    B, num_classes = 2, 4
    img_hw = 64
    level_sizes = ((8, 8), (4, 4))          # two FPN levels -> A = 80 (exercises padding)
    level_strides = (8, 16)
    M = 8                                    # max labels per image

    # Per-level anchor grid shifts / strides (each (1, A_level)).
    x_shifts, y_shifts, expanded_strides = [], [], []
    for (h, w), s in zip(level_sizes, level_strides):
        yv, xv = jnp.meshgrid(jnp.arange(h, dtype=jnp.float32),
                              jnp.arange(w, dtype=jnp.float32), indexing="ij")
        x_shifts.append(xv.reshape(1, -1))
        y_shifts.append(yv.reshape(1, -1))
        expanded_strides.append(jnp.full((1, h * w), float(s), jnp.float32))
    A = sum(h * w for h, w in level_sizes)   # 80 anchors total

    k1, k2 = jax.random.split(key)
    outputs = jax.random.normal(k1, (B, A, 5 + num_classes), jnp.float32)
    imgs = jax.random.normal(k2, (B, 3, img_hw, img_hw), jnp.float32)  # NCHW, unused here

    # labels[B, M, 5] = [cls, cx, cy, w, h]; batch 0 has 2 GTs, batch 1 has none
    # (exercises the num_gt == 0 zero-target branch).
    labels = jnp.zeros((B, M, 5), jnp.float32)
    labels = labels.at[0, 0].set(jnp.array([1.0, 20.0, 24.0, 16.0, 12.0]))
    labels = labels.at[0, 1].set(jnp.array([3.0, 48.0, 40.0, 10.0, 20.0]))

    loss_mod = YOLOXObjLoss({"num_classes": num_classes})
    y_hat = (imgs, x_shifts, y_shifts, expanded_strides, labels, outputs, None, jnp.float32)

    loss = loss_mod(None, y_hat)
    loss = jax.block_until_ready(loss)

    # Exact gather of the obj channel + identical BCE math -> tight tolerance
    # (only the f32 reduce order differs between kernel tiles and the reference).
    ref = _reference_loss(
        labels,
        jnp.concatenate(x_shifts, axis=1),
        jnp.concatenate(y_shifts, axis=1),
        jnp.concatenate(expanded_strides, axis=1),
        outputs[:, :, 4],
    )
    assert jnp.allclose(loss, ref, rtol=1e-5, atol=1e-5), (loss, ref)
    print("KERNEL_OK")
</pallas_src>

<mosaic_0001>
module attributes {stable_mosaic.version = 11 : i64} {
  func.func @_yolox_obj_loss_kernel(%arg0: i32, %arg1: i32, %arg2: memref<2xi32, #tpu.memory_space<smem>>, %arg3: memref<2x40xf32, #tpu.memory_space<smem>>, %arg4: memref<4x8x128xf32, #tpu.memory_space<vmem>>, %arg5: memref<1x8x128xf32, #tpu.memory_space<vmem>>, %arg6: memref<1x128xf32, #tpu.memory_space<vmem>>) attributes {dimension_semantics = [#tpu.dimension_semantics<parallel>, #tpu.dimension_semantics<parallel>], iteration_bounds = array<i64: 1, 2>, scalar_prefetch = 0 : i64, scratch_operands = 0 : i64, tpu.core_type = #tpu.core_type<tc>, window_params = [{transform_indices = @transform_0, window_bounds = array<i64: 2>}, {transform_indices = @transform_1, window_bounds = array<i64: 2, 40>}, {transform_indices = @transform_2, window_bounds = array<i64: 4, 8, 128>}, {transform_indices = @transform_3, window_bounds = array<i64: 1, 8, 128>}, {transform_indices = @transform_4, window_bounds = array<i64: 1, 128>}]} {
    %c0 = arith.constant 0 : index
    %c0_0 = arith.constant 0 : index
    %c0_1 = arith.constant 0 : index
    %0 = vector.load %arg4[%c0, %c0_0, %c0_1] : memref<4x8x128xf32, #tpu.memory_space<vmem>>, vector<1x8x128xf32>
    %1 = vector.shape_cast %0 : vector<1x8x128xf32> to vector<8x128xf32>
    %c1 = arith.constant 1 : index
    %c0_2 = arith.constant 0 : index
    %c0_3 = arith.constant 0 : index
    %2 = vector.load %arg4[%c1, %c0_2, %c0_3] : memref<4x8x128xf32, #tpu.memory_space<vmem>>, vector<1x8x128xf32>
    %3 = vector.shape_cast %2 : vector<1x8x128xf32> to vector<8x128xf32>
    %c2 = arith.constant 2 : index
    %c0_4 = arith.constant 0 : index
    %c0_5 = arith.constant 0 : index
    %4 = vector.load %arg4[%c2, %c0_4, %c0_5] : memref<4x8x128xf32, #tpu.memory_space<vmem>>, vector<1x8x128xf32>
    %5 = vector.shape_cast %4 : vector<1x8x128xf32> to vector<8x128xf32>
    %c3 = arith.constant 3 : index
    %c0_6 = arith.constant 0 : index
    %c0_7 = arith.constant 0 : index
    %6 = vector.load %arg4[%c3, %c0_6, %c0_7] : memref<4x8x128xf32, #tpu.memory_space<vmem>>, vector<1x8x128xf32>
    %7 = vector.shape_cast %6 : vector<1x8x128xf32> to vector<8x128xf32>
    %8 = arith.index_cast %arg1 : i32 to index
    %9 = memref.load %arg2[%8] : memref<2xi32, #tpu.memory_space<smem>>
    %cst = arith.constant 0.000000e+00 : f32
    %10 = vector.broadcast %cst : f32 to vector<8x128xf32>
    %c0_i32 = arith.constant 0 : i32
    %11 = arith.subi %9, %c0_i32 : i32
    %12 = arith.addi %c0_i32, %11 : i32
    %c1_i32 = arith.constant 1 : i32
    %13 = scf.for %arg7 = %c0_i32 to %12 step %c1_i32 iter_args(%arg8 = %10) -> (vector<8x128xf32>)  : i32 {
      %c5_i32 = arith.constant 5 : i32
      %51 = arith.muli %arg7, %c5_i32 : i32
      %c1_i32_22 = arith.constant 1 : i32
      %52 = arith.addi %51, %c1_i32_22 : i32
      %53 = arith.index_cast %arg1 : i32 to index
      %54 = arith.index_cast %52 : i32 to index
      %55 = memref.load %arg3[%53, %54] : memref<2x40xf32, #tpu.memory_space<smem>>
      %c2_i32 = arith.constant 2 : i32
      %56 = arith.addi %51, %c2_i32 : i32
      %57 = arith.index_cast %arg1 : i32 to index
      %58 = arith.index_cast %56 : i32 to index
      %59 = memref.load %arg3[%57, %58] : memref<2x40xf32, #tpu.memory_space<smem>>
      %c3_i32 = arith.constant 3 : i32
      %60 = arith.addi %51, %c3_i32 : i32
      %61 = arith.index_cast %arg1 : i32 to index
      %62 = arith.index_cast %60 : i32 to index
      %63 = memref.load %arg3[%61, %62] : memref<2x40xf32, #tpu.memory_space<smem>>
      %cst_23 = arith.constant 5.000000e-01 : f32
      %64 = arith.mulf %cst_23, %63 : f32
      %c4_i32 = arith.constant 4 : i32
      %65 = arith.addi %51, %c4_i32 : i32
      %66 = arith.index_cast %arg1 : i32 to index
      %67 = arith.index_cast %65 : i32 to index
      %68 = memref.load %arg3[%66, %67] : memref<2x40xf32, #tpu.memory_space<smem>>
      %cst_24 = arith.constant 5.000000e-01 : f32
      %69 = arith.mulf %cst_24, %68 : f32
      %70 = vector.broadcast %55 : f32 to vector<8x128xf32>
      %71 = arith.subf %1, %70 : vector<8x128xf32>
      %72 = math.absf %71 : vector<8x128xf32>
      %73 = vector.broadcast %59 : f32 to vector<8x128xf32>
      %74 = arith.subf %3, %73 : vector<8x128xf32>
      %75 = math.absf %74 : vector<8x128xf32>
      %76 = vector.broadcast %64 : f32 to vector<8x128xf32>
      %77 = arith.cmpf olt, %72, %76 : vector<8x128xf32>
      %78 = vector.broadcast %69 : f32 to vector<8x128xf32>
      %79 = arith.cmpf olt, %75, %78 : vector<8x128xf32>
      %80 = arith.andi %77, %79 : vector<8x128xi1>
      %81 = arith.cmpf olt, %72, %5 : vector<8x128xf32>
      %82 = arith.cmpf olt, %75, %5 : vector<8x128xf32>
      %83 = arith.andi %81, %82 : vector<8x128xi1>
      %84 = arith.ori %80, %83 : vector<8x128xi1>
      %85 = arith.extui %84 : vector<8x128xi1> to vector<8x128xi32>
      %86 = arith.sitofp %85 : vector<8x128xi32> to vector<8x128xf32>
      %87 = arith.maximumf %arg8, %86 : vector<8x128xf32>
      scf.yield %87 : vector<8x128xf32>
    }
    %14 = arith.mulf %13, %7 : vector<8x128xf32>
    %c0_8 = arith.constant 0 : index
    %c0_9 = arith.constant 0 : index
    %c0_10 = arith.constant 0 : index
    %15 = vector.load %arg5[%c0_8, %c0_9, %c0_10] : memref<1x8x128xf32, #tpu.memory_space<vmem>>, vector<1x8x128xf32>
    %16 = vector.shape_cast %15 : vector<1x8x128xf32> to vector<8x128xf32>
    %cst_11 = arith.constant 0.000000e+00 : f32
    %17 = vector.broadcast %cst_11 : f32 to vector<8x128xf32>
    %18 = arith.maximumf %16, %17 : vector<8x128xf32>
    %19 = arith.mulf %16, %14 : vector<8x128xf32>
    %20 = arith.subf %18, %19 : vector<8x128xf32>
    %21 = math.absf %16 : vector<8x128xf32>
    %cst_12 = arith.constant 0.000000e+00 : f32
    %22 = vector.broadcast %cst_12 : f32 to vector<8x128xf32>
    %23 = arith.subf %22, %21 : vector<8x128xf32>
    %24 = math.exp %23 : vector<8x128xf32>
    %cst_13 = arith.constant 1.000000e+00 : f32
    %25 = vector.broadcast %cst_13 : f32 to vector<8x128xf32>
    %26 = arith.addf %25, %24 : vector<8x128xf32>
    %27 = math.log %26 : vector<8x128xf32>
    %28 = arith.addf %20, %27 : vector<8x128xf32>
    %29 = arith.mulf %28, %7 : vector<8x128xf32>
    %30 = tpu.iota {dimensions = array<i32: 1>} : vector<1x128xi32>
    %c0_i32_14 = arith.constant 0 : i32
    %31 = vector.broadcast %c0_i32_14 : i32 to vector<1x128xi32>
    %32 = arith.cmpi eq, %30, %31 : vector<1x128xi32>
    %33 = vector.shape_cast %29 : vector<8x128xf32> to vector<1x8x128xf32>
    %cst_15 = arith.constant dense<0.000000e+00> : vector<1xf32>
    %34 = vector.multi_reduction <add>, %33, %cst_15 [1, 2] : vector<1x8x128xf32> to vector<1xf32>
    %35 = vector.shape_cast %34 : vector<1xf32> to vector<1x1x1xf32>
    %36 = vector.extract %35[0, 0, 0] : f32 from vector<1x1x1xf32>
    %cst_16 = arith.constant 0.000000e+00 : f32
    %37 = vector.broadcast %36 : f32 to vector<1x128xf32>
    %38 = vector.broadcast %cst_16 : f32 to vector<1x128xf32>
    %39 = arith.select %32, %37, %38 : vector<1x128xi1>, vector<1x128xf32>
    %c1_i32_17 = arith.constant 1 : i32
    %40 = vector.broadcast %c1_i32_17 : i32 to vector<1x128xi32>
    %41 = arith.cmpi eq, %30, %40 : vector<1x128xi32>
    %42 = vector.shape_cast %14 : vector<8x128xf32> to vector<1x8x128xf32>
    %cst_18 = arith.constant dense<0.000000e+00> : vector<1xf32>
    %43 = vector.multi_reduction <add>, %42, %cst_18 [1, 2] : vector<1x8x128xf32> to vector<1xf32>
    %44 = vector.shape_cast %43 : vector<1xf32> to vector<1x1x1xf32>
    %45 = vector.extract %44[0, 0, 0] : f32 from vector<1x1x1xf32>
    %cst_19 = arith.constant 0.000000e+00 : f32
    %46 = vector.broadcast %45 : f32 to vector<1x128xf32>
    %47 = vector.broadcast %cst_19 : f32 to vector<1x128xf32>
    %48 = arith.select %41, %46, %47 : vector<1x128xi1>, vector<1x128xf32>
    %49 = arith.addf %39, %48 : vector<1x128xf32>
    %c0_20 = arith.constant 0 : index
    %c0_21 = arith.constant 0 : index
    %50 = vector.load %arg6[%c0_20, %c0_21] : memref<1x128xf32, #tpu.memory_space<vmem>>, vector<1x128xf32>
    tpu.vector_store %arg6[%c0_20, %c0_21], %49 {strides = array<i32>} : memref<1x128xf32, #tpu.memory_space<vmem>>, vector<1x128xf32>,
    return
  }
  func.func @transform_0(%arg0: i32, %arg1: i32) -> i32 {
    %c0_i32 = arith.constant 0 : i32
    %c0_i32_0 = arith.constant 0 : i32
    return %c0_i32 : i32
  }
  func.func @transform_1(%arg0: i32, %arg1: i32) -> (i32, i32) {
    %c0_i32 = arith.constant 0 : i32
    %c0_i32_0 = arith.constant 0 : i32
    %c0_i32_1 = arith.constant 0 : i32
    return %c0_i32, %c0_i32_0 : i32, i32
  }
  func.func @transform_2(%arg0: i32, %arg1: i32) -> (i32, i32, i32) {
    %c0_i32 = arith.constant 0 : i32
    %c0_i32_0 = arith.constant 0 : i32
    %c0_i32_1 = arith.constant 0 : i32
    return %c0_i32, %arg0, %c0_i32_0 : i32, i32, i32
  }
  func.func @transform_3(%arg0: i32, %arg1: i32) -> (i32, i32, i32) {
    %c0_i32 = arith.constant 0 : i32
    %c0_i32_0 = arith.constant 0 : i32
    return %arg1, %arg0, %c0_i32 : i32, i32, i32
  }
  func.func @transform_4(%arg0: i32, %arg1: i32) -> (i32, i32) {
    %c2_i32 = arith.constant 2 : i32
    %0 = arith.muli %arg0, %c2_i32 : i32
    %1 = arith.addi %0, %arg1 : i32
    %c0_i32 = arith.constant 0 : i32
    %c0_i32_0 = arith.constant 0 : i32
    return %c0_i32, %1 : i32, i32
  }
}

</mosaic_0001>

<bundles_post_ra>
// kernel: tpu_custom_call.1
= control target key start
LH: loop header
LB: loop body
LE: loop exit
PB: predicated region body
PF: predicated region fallthrough
CT: control target
= control target key end

     0   :  { %s1223_s0 = inlined_call_operand.hbm [shape: s32[2], index: 0, kind: input, shape index: {}]   ;;  %s1224_s1 = inlined_call_operand.vmem [shape: f32[2,40], index: 1, kind: input, shape index: {}]   ;;  %s1225_s2 = inlined_call_operand.hbm [shape: f32[4,8,128], index: 2, kind: input, shape index: {}]   ;;  %s1226_s3 = inlined_call_operand.hbm [shape: f32[2,8,128], index: 3, kind: input, shape index: {}]   ;;  %s1227_s4 = inlined_call_operand.hbm [shape: f32[1,256], index: 4, kind: output, shape index: {}]  }
   0x1   :  { %1239 = sst [smem:[#allocation24_spill]] %s1223_s0 }
   0x2   :  { %1240 = sst [smem:[#allocation25_spill]] %s1224_s1 }
   0x3   :  { %1241 = sst [smem:[#allocation26_spill]] %s1225_s2 }
   0x4   :  { %1242 = sst [smem:[#allocation27_spill]] %s1226_s3 }
   0x5   :  { %9 = vsyncpa [#allocation5], 0 }
   0x6   :  { %10 = vsyncpa [#allocation6], 0 }
   0x7   :  { %11 = vsyncpa [#allocation3], 0 }
   0x8   :  { %12 = vsyncpa [#allocation10], 0 }
   0x9   :  { %14 = vsyncpa [#allocation10 + $0x1], 0 }
   0xa   :  { %15 = vsyncpa [#allocation4], 0 }
   0xb   :  { %17 = vsyncpa [#allocation4 + $0x1], 0  ;;  %s922_s15 = smov 0   ;;  %s924_s16 = smov 0  }
   0xc   :  { %s926_s17 = smov 0   ;;  %s928_s18 = smov 0  }
   0xd   :  { %s930_s19 = smov 0   ;;  %s932_s20 = smov 0  }
   0xe LB: > { %1243 = sst [smem:[#allocation17_spill]] %s859_s16  ;;  %s532_s21 = sadd.s32 4294967295, %s875_s20   ;;  %s875_s20 = sphi %s932_s20, %s23_s20   ;;  %s871_s19 = sphi %s930_s19, %s1276_s19   ;;  %s867_s18 = sphi %s928_s18, %s1275_s18   ;;  %s863_s17 = sphi %s926_s17, %s1274_s17   ;;  %s859_s16 = sphi %s924_s16, %s1273_s16   ;;  %s855_s15 = sphi %s922_s15, %s1272_s15  }
   0xf   : > { %1244 = sst [smem:[#allocation18_spill]] %s863_s17  ;;  %s533_s22 = sadd.s32 4294967294, %s875_s20  }
  0x10   : > { %1245 = sst [smem:[#allocation19_spill]] %s871_s19  ;;  %p125_p0 = scmp.ne.s32.totalorder %s859_s16, %s855_s15 }
  0x11   : > { %1246 = sst [smem:[#allocation20_spill]] %s875_s20  ;;  %p956_p1 = scmp.eq.s32.totalorder %s532_s21, 0 }
  0x12   : > { %p960_p2 = scmp.eq.s32.totalorder %s532_s21, 1  ;;  %p159_p3 = scmp.eq.s32.totalorder %s533_s22, 1 }
  0x13   : > { %s1247_s23 = scalar_select %p956_p1, 1, 0 }
  0x14   : > { %p966_p4 = por %p956_p1, %p125_p0  ;;  %p534_p5 = scmp.ge.s32.totalorder %s875_s20, 1 }
  0x15   : > { %p971_p6 = por %p159_p3, %p125_p0  ;;  %p166_p7 = scmp.lt.s32.totalorder %s875_s20, 3 }
  0x16   : > { %s1249_s25 = scalar_select %p966_p4, 1, 0 }
  0x17   : > { %s1250_s26 = scalar_select %p971_p6, 1, 0 }
  0x18   : > { %p976_p8 = pnand %p534_p5, %p166_p7  ;;  %s1253_s1 = sld [smem:[#allocation25_spill]] }
  0x19   : > { %1251 = sst [smem:[#allocation21_spill]] %s1250_s26  ;;  %s889_s6 = smov [#allocation8]  }
  0x1a   : > { %p575_p10 = pneg %p976_p8  ;;  %s200_s7 = sshll.u32 %s889_s6, 4  ;;  %s992_s7 = int_to_ptr.vmem [resolvable:$true] %s200_s7 }
  0x1b   : > { %s1255_s0 = sld [smem:[#allocation24_spill]] }
  0x1c   : > { %p988_p11 = pnand %p575_p10, %p956_p1 }
  0x1e   : > { %s188_s30 = sshll.u32 %s1253_s1, 4  ;;  %p685_p13 = pneg %p988_p11  ;;  %s189_s30 = int_to_ptr.vmem [resolvable:$true] %s188_s30 }
  0x21   : > { %s683_s10 = scalar_lea.hbm %s1255_s0, 16 }
  0x22   : > { %p684_p12 = scmp.ne.s32.totalorder %s1255_s0, %s683_s10  ;;  %p690_p5 = scmp.lt.u32.totalorder %s683_s10, %s1255_s0 }
  0x24   : > { %p686_p0 = pnand %p685_p13, %p684_p12 }
  0x26   : > { %p687_p3 = pneg %p686_p0 }
  0x28   : > { %p692_p7 = pnand %p690_p5, %p687_p3 }
  0x2a   : > { %695 = shalt.err (!%p692_p7)
}
  0x2b   : > { %s890_s21 = smov [#allocation2]   ;;  %s696_s29 = scalar_lea.vmem %s189_s30, 32 }
  0x2c   : > { %578 = dma.hbm_to_smem (!%p988_p11), %s1255_s0, 16, %s890_s21, [#allocation5]  }
  0x2d   : > { %p697_p10 = scmp.ne.s32.totalorder %s189_s30, %s696_s29  ;;  %p704_p9 = scmp.lt.s32.totalorder %s189_s30, %s189_s30 }
  0x2e   : > { %p705_p6 = scmp.lt.s32.totalorder %s696_s29, %s696_s29 }
  0x2f   : > { %p699_p12 = pnand %p697_p10, %p685_p13 }
  0x30   : > { %p706_p4 = por %p705_p6, %p704_p9 }
  0x31   : > { %p700_p0 = pneg %p699_p12 }
  0x33   : > { %p707_p1 = pnand %p706_p4, %p700_p0 }
  0x35   : > { %710 = shalt.err (!%p707_p1)
}
  0x36   : > { %s891_s6 = smov [#allocation7]   ;;  %s1256_s2 = sld [smem:[#allocation26_spill]] }
  0x37   : > { %581 = dma.vmem_to_smem (!%p988_p11), %s189_s30, 32, %s891_s6, [#allocation6]  }
  0x3c   : > { %s711_s10 = scalar_lea.hbm %s1256_s2, 512 }
  0x3d   : > { %p712_p3 = scmp.ne.s32.totalorder %s1256_s2, %s711_s10  ;;  %p718_p1 = scmp.lt.u32.totalorder %s711_s10, %s1256_s2 }
  0x3f   : > { %p714_p5 = pnand %p712_p3, %p685_p13 }
  0x41   : > { %p715_p7 = pneg %p714_p5 }
  0x43   : > { %p720_p4 = pnand %p718_p1, %p715_p7 }
  0x45   : > { %723 = shalt.err (!%p720_p4)
}
  0x46   : > { %s724_s30 = scalar_lea.vmem %s992_s7, 512  ;;  %p732_p12 = scmp.lt.s32.totalorder %s992_s7, %s992_s7 }
  0x47   : > { %p725_p6 = scmp.ne.s32.totalorder %s992_s7, %s724_s30  ;;  %p733_p0 = scmp.lt.s32.totalorder %s724_s30, %s724_s30 }
  0x49   : > { %p727_p9 = pnand %p725_p6, %p685_p13  ;;  %p734_p3 = por %p733_p0, %p732_p12 }
  0x4b   : > { %p728_p10 = pneg %p727_p9 }
  0x4d   : > { %p735_p5 = pnand %p734_p3, %p728_p10 }
  0x4f   : > { %738 = shalt.err (!%p735_p5)
}
  0x50   : > { %s892_s21 = smov 128   ;;  %s893_s22 = smov 8  }
  0x51   : > { %584 = dma.hbm_to_vmem [thread:$0]  (!%p988_p11), %s1256_s2, 512, %s992_s7, [#allocation3], %s892_s21, %s892_s21, %s893_s22  }
  0x52   : > { %s112_s6 = sadd.s32 1, %s863_s17  ;;  %s32_s8 = sadd.s32 1, %s871_s19 }
  0x53   : > { %p119_p13 = scmp.ne.s32.totalorder %s863_s17, %s859_s16  ;;  %p33_p7 = scmp.ge.s32.totalorder %s32_s8, 2 }
  0x54   : > { %p120_p1 = scmp.eq.s32.totalorder %s875_s20, 0  ;;  %p596_p6 = scmp.lt.s32.totalorder %s875_s20, 2 }
  0x55   : > { %p1050_p4 = por %p960_p2, %p119_p13  ;;  %s1278_s8 = smov (%p33_p7, %s32_s8), 0 }
  0x56   : > { %1258 = sst [smem:[#allocation22_spill]] %s1278_s8  ;;  %p121_p9 = por %p120_p1, %p119_p13 }
  0x57   : > { %s1257_s9 = scalar_select %p1050_p4, 1, 0 }
  0x58   : > { %s214_s5 = sand.u32 1, %s863_s17   ;;  %s107_s10 = ssub.s32 %s871_s19, %s1278_s8 }
  0x59   : > { %p110_p10 = scmp.eq.s32.totalorder %s107_s10, 0  ;;  %s539_s7 = sshll.u32 %s214_s5, 3 }
  0x5a   : > { %s540_s11 = sshll.u32 %s871_s19, 7  ;;  %s1260_s3 = sld [smem:[#allocation27_spill]] }
  0x5b   : > { %s1062_s12 = scalar_select %p110_p10, %s863_s17, %s112_s6  }
  0x5c   : > { %s218_s30 = scalar_lea.vmem [#allocation9], %s539_s7  ;;  %p1073_p2 = pnand %p596_p6, %p121_p9 }
  0x5d   : > { %1259 = sst [smem:[#allocation23_spill]] %s1062_s12  ;;  %s226_s21 = sshll.u32 %s218_s30, 4  ;;  %s1069_s21 = int_to_ptr.vmem [resolvable:$true] %s226_s21 }
  0x5e   : > { %s215_s28 = scalar_lea.sflag [#allocation10], %s214_s5  ;;  %p741_p12 = pneg %p1073_p2 }
  0x60   : > { %s1067_s24 = scalar_lea.hbm %s1260_s3, %s540_s11  ;;  %s744_s7 = scalar_lea.hbm %s1260_s3, 256 }
  0x61   : > { %s739_s29 = scalar_lea.hbm %s1067_s24, 128  ;;  %p745_p5 = scmp.lt.u32.totalorder %s1067_s24, %s1260_s3 }
  0x62   : > { %p740_p11 = scmp.ne.s32.totalorder %s1067_s24, %s739_s29  ;;  %p746_p13 = scmp.lt.u32.totalorder %s744_s7, %s739_s29 }
  0x63   : > { %p748_p1 = scmp.lt.u32.totalorder %s739_s29, %s1067_s24 }
  0x64   : > { %p742_p0 = pnand %p741_p12, %p740_p11  ;;  %p747_p7 = por %p746_p13, %p745_p5 }
  0x66   : > { %p743_p3 = pneg %p742_p0  ;;  %p749_p6 = por %p748_p1, %p747_p7 }
  0x68   : > { %p750_p9 = pnand %p749_p6, %p743_p3 }
  0x6a   : > { %753 = shalt.err (!%p750_p9)
}
  0x6b   : > { %s754_s5 = scalar_lea.vmem %s1069_s21, 128  ;;  %s894_s14 = smov [#allocation9]  }
  0x6c   : > { %p755_p10 = scmp.ne.s32.totalorder %s1069_s21, %s754_s5  ;;  %s759_s30 = sshll.u32 %s894_s14, 4  ;;  %s760_s30 = int_to_ptr.vmem [resolvable:$false] %s759_s30 }
  0x6d   : > { %s761_s6 = scalar_lea.vmem %s760_s30, 256  ;;  %p762_p4 = scmp.lt.s32.totalorder %s1069_s21, %s760_s30 }
  0x6e   : > { %p757_p11 = pnand %p755_p10, %p741_p12  ;;  %p763_p5 = scmp.lt.s32.totalorder %s761_s6, %s754_s5 }
  0x70   : > { %p758_p0 = pneg %p757_p11  ;;  %p764_p13 = por %p763_p5, %p762_p4 }
  0x72   : > { %p765_p7 = pnand %p764_p13, %p758_p0 }
  0x74   : > { %768 = shalt.err (!%p765_p7)
}
  0x75   : > { %588 = dma.hbm_to_vmem [thread:$0]  (!%p1073_p2), %s1067_s24, 128, %s1069_s21, %s215_s28  }
  0x76   : > { %235 = sbr.rel (%p976_p8) target bundleno = 446 (0x1be), region = 36  ;;  %p1262_p12 = scmp.ne.s32.totalorder (!%p976_p8), %s1247_s23, 0 }
  0x7d   : > { %834 = dma.done.wait (%p1262_p12), [#allocation5], 16  }
  0x7e   : > { %836 = vsyncadd (%p1262_p12), [#allocation5], 4294967280 }
  0x7f   : > { %838 = dma.done.wait (%p1262_p12), [#allocation6], 32  }
  0x80   : > { %840 = vsyncadd (%p1262_p12), [#allocation6], 4294967264 }
  0x81   : > { %842 = dma.done.wait (%p1262_p12), [#allocation3], 512  }
  0x82   : > { %844 = vsyncadd (%p1262_p12), [#allocation3], 4294966784  ;;  %s1117_s27 = sand.u32 1, %s859_s16   ;;  %p1263_p8 = scmp.ne.s32.totalorder %s1249_s25, 0 }
  0x83   : > { %s545_s24 = sshll.u32 %s1117_s27, 3  ;;  %s250_s21 = scalar_lea.sflag [#allocation10], %s1117_s27 }
  0x84   : > { %s1121_s22 = scalar_lea.vmem [#allocation9], %s545_s24 }
  0x85   : > { %846 = dma.done.wait (%p1263_p8), %s250_s21, 128  }
  0x86   : > { %848 = vsyncadd (%p1263_p8), %s250_s21, 4294967168 }
  0x87   : > { %258 = sfence }
  0x88   : > { %v1127_v0 = vld [vmem:[#allocation8] sm:$0xff]  ;;  %v1129_v1 = vld [vmem:[#allocation8 + $0x8] sm:$0xff]  ;;  %v1131_v2 = vld [vmem:[#allocation8 + $0x10] sm:$0xff]  ;;  %s1134_s23 = sld [smem:[#allocation2 + %s867_s18]]  ;;  %v1140_v4 = vmov 0.0  }
  0x89   : > { %v1136_v3 = vld [vmem:[#allocation8 + $0x18] sm:$0xff] }
  0x8e   : > { %p546_p4 = scmp.le.s32.totalorder %s1134_s23, 0 }
  0x8f   : > { %v877_v5 = vmov (!%p546_p4), 0.0   ;;  %s1142_s25 = smov (!%p546_p4), 0  }
  0x90   : > { %468 = sbr.rel (%p546_p4) target bundleno = 183 (0xb7), region = 101 }
  0x97 LB: >> { %s295_s29 = smul.u32 5, %s883_s25  ;;  %v895_v14 = vmov 0.0   ;;  %s291_s25 = sadd.s32 1, %s883_s25   ;;  %s883_s25 = sphi %s1142_s25, %s291_s25   ;;  %v879_v5 = vphi %v877_v5, %v878_v5  }
  0x98   : >> { %p290_p2 = scmp.ge.s32.totalorder %s291_s25, %s1134_s23 }
  0x99   : >> { %s296_s10 = sadd.s32 1, %s295_s29  ;;  %s305_s7 = sadd.s32 2, %s295_s29 }
  0x9a   : >> { %s297_s11 = sshra.s32 %s296_s10, 7  ;;  %s302_s13 = sand.u32 127, %s296_s10 }
  0x9b   : >> { %s299_s5 = sadd.s32 %s867_s18, %s297_s11  ;;  %s306_s14 = sshra.s32 %s305_s7, 7 }
  0x9c   : >> { %s547_s30 = sshll.u32 %s299_s5, 7  ;;  %s308_s6 = sadd.s32 %s867_s18, %s306_s14 }
  0x9d   : >> { %s303_s24 = sadd.s32 %s547_s30, %s302_s13  ;;  %s548_s21 = sshll.u32 %s308_s6, 7 }
  0x9e   : >> { %s304_s28 = sld [smem:[#allocation7 + %s303_s24]]  ;;  %s311_s0 = sand.u32 127, %s305_s7 }
  0x9f   : >> { %s312_s1 = sadd.s32 %s548_s21, %s311_s0  ;;  %s314_s2 = sadd.s32 3, %s295_s29 }
  0xa0   : >> { %s313_s3 = sld [smem:[#allocation7 + %s312_s1]]  ;;  %s315_s8 = sshra.s32 %s314_s2, 7 }
  0xa1   : >> { %s317_s19 = sadd.s32 %s867_s18, %s315_s8  ;;  %s320_s12 = sand.u32 127, %s314_s2 }
  0xa2   : >> { %s549_s17 = sshll.u32 %s317_s19, 7  ;;  %s324_s16 = sadd.s32 4, %s295_s29 }
  0xa3   : >> { %s321_s20 = sadd.s32 %s549_s17, %s320_s12  ;;  %s325_s26 = sshra.s32 %s324_s16, 7 }
  0xa4   : >> { %s322_s10 = sld [smem:[#allocation7 + %s321_s20]]  ;;  %s327_s11 = sadd.s32 %s867_s18, %s325_s26  ;;  %v334_v6 = vstv %s304_s28 }
  0xa5   : >> { %s550_s5 = sshll.u32 %s327_s11, 7  ;;  %s330_s14 = sand.u32 127, %s324_s16  ;;  %v335_v7 = vsub.f32 %v1127_v0, %v334_v6 }
  0xa6   : >> { %s331_s13 = sadd.s32 %s550_s5, %s330_s14  ;;  %v337_v8 = vstv %s313_s3 }
  0xa7   : >> { %s332_s7 = sld [smem:[#allocation7 + %s331_s13]]  ;;  %v338_v9 = vsub.f32 %v1129_v1, %v337_v8  ;;  %v336_v10 = vand.u32 2147483647, %v335_v7 }
  0xa9   : >> { %v339_v11 = vand.u32 2147483647, %v338_v9  ;;  %vm345_vm0 = vcmp.lt.f32.partialorder %v336_v10, %v1131_v2 }
  0xaa   : >> { %s323_s0 = smul.f32 0.5, %s322_s10 }
  0xab   : >> { %vm346_vm1 = vcmp.lt.f32.partialorder %v339_v11, %v1131_v2 }
  0xac   : >> { %v340_v12 = vstv %s323_s0  ;;  %vm347_vm3 = vmand %vm345_vm0, %vm346_vm1 }
  0xad   : >> { %s333_s1 = smul.f32 0.5, %s332_s7  ;;  %vm341_vm2 = vcmp.lt.f32.partialorder %v336_v10, %v340_v12 }
  0xaf   : >> { %v342_v13 = vstv %s333_s1 }
  0xb0   : >> { %vm343_vm4 = vcmp.lt.f32.partialorder %v339_v11, %v342_v13  ;;  %293 = sbr.rel (!%p290_p2) target bundleno = 151 (0x97), region = 107 }
  0xb1   : >> { %vm344_vm5 = vmand %vm341_vm2, %vm343_vm4 }
  0xb2   : >> { %vm348_vm6 = vmor %vm344_vm5, %vm347_vm3 }
  0xb3   : >> { %v551_v15 = vsel %vm348_vm6, 1.0, %v895_v14 }
  0xb4   : >> { %v351_v16 = vmax.f32 %v879_v5, %v551_v15  }
  0xb6   : >> { %v878_v5 = vmov %v351_v16   ;;  %v1264_v4 = vmov (%p290_p2), %v351_v16 }
  0xb7 PF: > { %v353_v17 = vld [vmem:[%s1121_s22] sm:$0xff]  ;;  %v352_v23 = vmul.f32 %v887_v4, %v1136_v3  ;;  %v366_v45 = vlaneseq  ;;  %s552_s3 = sshll.u32 %s867_s18, 4  ;;  %s1265_s17 = scalar_lea.vmem [#allocation11], %s1117_s27  ;;  %v887_v4 = vphi %v1140_v4, %v1264_v4  }
  0xb8   : > { %v357_v18 = vand.u32 2147483647, %v353_v17  ;;  %v354_v24 = vmax.f32 %v353_v17, 0.0  ;;  %s409_s19 = sshll.u32 %s1265_s17, 4  ;;  %s1172_s8 = scalar_lea.hbm %s1227_s4, %s552_s3  ;;  %s1174_s19 = int_to_ptr.vmem [resolvable:$true] %s409_s19 }
  0xb9   : > { %v355_v25 = vmul.f32 %v353_v17, %v352_v23  ;;  %v367_v46 = vand.u32 127, %v366_v45  ;;  %s1266_s12 = smov %s1265_s17  ;;  %s395_s18 = scalar_lea.sflag [#allocation4], %s1117_s27 }
  0xba   : > { %v358_v19 = vsub.f32 0.0, %v357_v18  ;;  %s769_s22 = scalar_lea.vmem %s1174_s19, 16  ;;  %p1267_p1 = scmp.ne.s32.totalorder %s1257_s9, 0 }
  0xbb   : > { %v356_v26 = vsub.f32 %v354_v24, %v355_v25  ;;  %vm368_vm7 = vcmp.eq.s32.totalorder %v367_v46, 0  ;;  %vm380_vm8 = vcmp.eq.s32.totalorder %v367_v46, 1  ;;  %p770_p3 = scmp.ne.s32.totalorder %s1174_s19, %s769_s22  ;;  %s896_s23 = smov [#allocation11]  }
  0xbc   : > { %v359_v20 = vmul.f32 1.442695, %v358_v19  ;;  %s773_s28 = sshll.u32 %s896_s23, 4  ;;  %s774_s28 = int_to_ptr.vmem [resolvable:$false] %s773_s28 }
  0xbd   : > { %p771_p6 = pnand %p770_p3, %p1267_p1  ;;  %s775_s25 = scalar_lea.vmem %s774_s28, 32 }
  0xbe   : > { %679 = vpow2.f32 %v359_v20  ;;  %p776_p10 = scmp.lt.s32.totalorder %s1174_s19, %s774_s28  ;;  %p777_p11 = scmp.lt.s32.totalorder %s775_s25, %s769_s22 }
  0xbf   : > { %p772_p9 = pneg %p771_p6 }
  0xc0   : > { %p778_p0 = por %p777_p11, %p776_p10 }
  0xc2   : > { %p779_p5 = pnand %p778_p0, %p772_p9 }
  0xc8   : > { %v680_v21 = vpop.eup %679 }
  0xc9   : > { %v361_v22 = vadd.f32 1.0, %v680_v21 }
  0xcb   : > { %681 = vlog2.f32 %v361_v22 }
  0xd5   : > { %v682_v27 = vpop.eup %681 }
  0xd6   : > { %v363_v28 = vmul.f32 0.6931472, %v682_v27 }
  0xd8   : > { %v364_v29 = vadd.f32 %v363_v28, %v356_v26 }
  0xda   : > { %v365_v30 = vmul.f32 %v364_v29, %v1136_v3 }
  0xdc   : > { %369 = vadd.xlane.f32.xlu0 %v365_v30 }
  0xe0   : > { %381 = vadd.xlane.f32.xlu0 %v352_v23 }
 0x169   : > { %v370_v31 = vpop.xlane.xlu0 %369 }
 0x16a   : > { %v371_v32 = vrot.slane %v370_v31, 4 }
 0x16c   : > { %v372_v33 = vadd.f32 %v371_v32, %v370_v31 }
 0x16d   : > { %v382_v34 = vpop.xlane.xlu0 %381 }
 0x16e   : > { %v373_v35 = vrot.slane %v372_v33, 2  ;;  %v383_v36 = vrot.slane %v382_v34, 4 }
 0x170   : > { %v384_v37 = vadd.f32 %v383_v36, %v382_v34  ;;  %v374_v38 = vadd.f32 %v373_v35, %v372_v33 }
 0x172   : > { %v385_v39 = vrot.slane %v384_v37, 2  ;;  %v375_v40 = vrot.slane %v374_v38, 1 }
 0x174   : > { %v386_v41 = vadd.f32 %v385_v39, %v384_v37  ;;  %v376_v42 = vadd.f32 %v375_v40, %v374_v38 }
 0x176   : > { %555 = vpush %v376_v42  ;;  %v387_v43 = vrot.slane %v386_v41, 1 }
 0x178   : > { %v388_v44 = vadd.f32 %v387_v43, %v386_v41 }
 0x17a   : > { %557 = vpush %v388_v44 }
 0x1a7   : > { %s556_s2 = spop %555 }
 0x1a8   : > { %v378_v47 = vstv %s556_s2 }
 0x1a9   : > { %v379_v49 = vsel %vm368_vm7, %v378_v47, 0.0 }
 0x1ab   : > { %s558_s16 = spop %557 }
 0x1ac   : > { %v390_v48 = vstv %s558_s16 }
 0x1ad   : > { %v391_v50 = vsel %vm380_vm8, %v390_v48, 0.0 }
 0x1ae   : > { %v392_v51 = vadd.f32 %v391_v50, %v379_v49 }
 0x1b0   : > { %393 = vst [vmem:[%s1266_s12] sm:$0x1] %v392_v51 }
 0x1b1   : > { %782 = shalt.err (!%p779_p5)
}
 0x1b2   : > { %s783_s27 = scalar_lea.hbm %s1172_s8, 16  ;;  %s787_s6 = scalar_lea.hbm %s1227_s4, 32 }
 0x1b3   : > { %p784_p13 = scmp.ne.s32.totalorder %s1172_s8, %s783_s27  ;;  %p788_p8 = scmp.lt.u32.totalorder %s1172_s8, %s1227_s4 }
 0x1b4   : > { %p789_p4 = scmp.lt.u32.totalorder %s787_s6, %s783_s27  ;;  %p791_p3 = scmp.lt.u32.totalorder %s783_s27, %s1172_s8 }
 0x1b5   : > { %p785_p7 = pnand %p784_p13, %p1267_p1 }
 0x1b6   : > { %p790_p2 = por %p789_p4, %p788_p8 }
 0x1b7   : > { %p786_p12 = pneg %p785_p7 }
 0x1b8   : > { %p792_p6 = por %p791_p3, %p790_p2 }
 0x1ba   : > { %p793_p9 = pnand %p792_p6, %p786_p12 }
 0x1bc   : > { %796 = shalt.err (!%p793_p9)
}
 0x1bd   : > { %573 = dma.vmem_to_hbm [thread:$0]  (%p1267_p1), %s1174_s19, 16, %s1172_s8, %s395_s18  }
 0x1be PF: > { %s1268_s10 = sld [smem:[#allocation21_spill]]  ;;  %s1269_s11 = sld [smem:[#allocation20_spill]] }
 0x1bf   : > { %s421_s5 = sand.u32 1, %s855_s15  }
 0x1c0   : > { %s422_s14 = scalar_lea.sflag [#allocation4], %s421_s5 }
 0x1c4   : > { %p1270_p10 = scmp.ne.s32.totalorder %s1268_s10, 0  ;;  %p1271_p11 = scmp.ge.s32.totalorder %s1269_s11, 2 }
 0x1c6   : > { %p590_p0 = pnand %p1271_p11, %p1270_p10 }
 0x1c8   : > { %850 = dma.done.wait (!%p590_p0), %s422_s14, 16  }
 0x1c9   : > { %852 = vsyncadd (!%p590_p0), %s422_s14, 4294967280  ;;  %s23_s20 = sadd.s32 1, %s1269_s11   ;;  %s1272_s15 = sld [smem:[#allocation17_spill]] }
 0x1ca   : > { %p20_p5 = scmp.ge.s32.totalorder %s23_s20, 4   ;;  %s1273_s16 = sld [smem:[#allocation18_spill]] }
 0x1cb   : > { %s1274_s17 = sld [smem:[#allocation23_spill]]  ;;  %s1275_s18 = sld [smem:[#allocation19_spill]] }
 0x1cc   : > { %s1276_s19 = sld [smem:[#allocation22_spill]]  ;;  %22 = sbr.rel (!%p20_p5) target bundleno = 14 (0xe), region = 118 }
 0x1d3   :  { %426 = vsyncpa [#allocation3], 1 }
 0x1d4   :  { %428 = vsyncpa [#allocation3 + $0x1], 1 }
 0x1d5   :  { %429 = vsyncpa [#allocation10], 1 }
 0x1d6   :  { %431 = vsyncpa [#allocation10 + $0x1], 1 }
 0x1d7   :  { %432 = vsyncpa [#allocation4], 1 }
 0x1d8   :  { %434 = vsyncpa [#allocation4 + $0x1], 1 }
 0x1d9   :  { %435 = vsyncpa [#allocation5], 1 }
 0x1da   :  { %437 = vsyncpa [#allocation5 + $0x1], 1 }
 0x1db   :  { %438 = vsyncpa [#allocation6], 1 }
 0x1dc   :  { %440 = vsyncpa [#allocation6 + $0x1], 1 }

</bundles_post_ra>
